<compile_context>
chip_gen: v7x
topology: tpu7x:2x2x1
jax: 0.10.0
libtpu: 0.0.40
codegen_flags: <defaults>
</compile_context>

<pallas_src>
import jax
import jax.numpy as jnp
from jax.experimental import pallas as pl
from jax.experimental.pallas import tpu as pltpu


# --------------------------------------------------------------------------- #
# Kernels
# --------------------------------------------------------------------------- #
def _ln_linear_kernel_batch_outer(x_ref, w_ref, b_ref, o_ref, xn_ref):
    # grid = (batch_tiles, out_tiles); axis 1 (OUT) is the INNER axis.
    # x_ref : (TM, D)  native dtype  -- block index only changes with the batch
    #                                   tile, so Pallas fetches it once per batch
    #                                   tile (no re-DMA across OUT tiles).
    # w_ref : (D, TN)  compute dtype -- gamma already folded in
    # b_ref : (1, TN)  f32           -- beta @ W bias row
    # o_ref : (TM, TN) output dtype  -- lane-dense (TN multiple of 128)
    # xn_ref: (TM, D)  compute dtype -- VMEM scratch holding normalized x
    @pl.when(pl.program_id(1) == 0)
    def _():
        x = x_ref[...].astype(jnp.float32)
        d = x.shape[-1]
        # Single-sweep LN statistics (biased variance, eps=1e-5, as nn.LayerNorm).
        s1 = jnp.sum(x, axis=-1, keepdims=True)
        s2 = jnp.sum(x * x, axis=-1, keepdims=True)
        mean = s1 * (1.0 / d)
        var = s2 * (1.0 / d) - mean * mean
        xn_ref[...] = ((x - mean) * jax.lax.rsqrt(var + 1e-5)).astype(xn_ref.dtype)

    y = jnp.dot(xn_ref[...], w_ref[...], preferred_element_type=jnp.float32)
    o_ref[...] = (y + b_ref[...].astype(jnp.float32)).astype(o_ref.dtype)


def _ln_linear_kernel_out_outer(x_ref, w_ref, b_ref, o_ref):
    # grid = (out_tiles, batch_tiles); weight slab stays VMEM-resident across the
    # inner batch axis.  LN is recomputed per step (chosen only when that is
    # cheaper than re-reading the weight in the batch-outer ordering).
    x = x_ref[...].astype(jnp.float32)
    d = x.shape[-1]
    s1 = jnp.sum(x, axis=-1, keepdims=True)
    s2 = jnp.sum(x * x, axis=-1, keepdims=True)
    mean = s1 * (1.0 / d)
    var = s2 * (1.0 / d) - mean * mean
    xn = (x - mean) * jax.lax.rsqrt(var + 1e-5)
    y = jnp.dot(xn.astype(w_ref.dtype), w_ref[...], preferred_element_type=jnp.float32)
    o_ref[...] = (y + b_ref[...].astype(jnp.float32)).astype(o_ref.dtype)


# --------------------------------------------------------------------------- #
# Wrapper helpers
# --------------------------------------------------------------------------- #
def _round_up(n, m):
    return ((n + m - 1) // m) * m


def _vmem_budget_bytes():
    # Derive from hardware, leave ~25% headroom for compiler-internal scratch.
    try:
        cap = int(pltpu.get_tpu_info().vmem_capacity_bytes)
    except Exception:
        cap = 64 << 20  # assume worst case (v7x: 64 MiB per TensorCore)
    return max(16 << 20, (cap * 3) // 4)


def prepare_linear_params(gamma, beta, w, *, compute_dtype=None):
    """One-time (weight-load-time) fold of the LayerNorm affine into the weight.

    gamma, beta: (D,) LayerNorm affine.  w: (D, OUT) = PyTorch linear.weight.T.
    (norm(x)*gamma + beta) @ W == norm(x) @ (gamma[:,None]*W) + (beta @ W).
    Returns padded, compute-dtype weights so the per-call path does no weight work.
    """
    D, OUT = w.shape
    if compute_dtype is None:
        compute_dtype = w.dtype           # set to jnp.bfloat16 to force bf16 MXU path
    compute_dtype = jnp.dtype(compute_dtype)

    w_f32 = w.astype(jnp.float32)
    w_fold = (gamma.astype(jnp.float32)[:, None] * w_f32).astype(compute_dtype)
    bias = (beta.astype(jnp.float32) @ w_f32).reshape(1, OUT).astype(jnp.float32)

    # Lane-dense output tile: biggest of {512, 256, 128} that the 128-padded OUT
    # divides evenly and whose double-buffered weight slab stays well inside VMEM.
    budget = _vmem_budget_bytes()
    w_item = compute_dtype.itemsize
    out_128 = _round_up(OUT, 128)
    tn = 128
    for cand in (512, 256):
        if out_128 % cand == 0 and 2 * D * cand * w_item <= budget // 2:
            tn = cand
            break
    out_pad = _round_up(OUT, tn)
    if out_pad != OUT:
        w_fold = jnp.pad(w_fold, ((0, 0), (0, out_pad - OUT)))
        bias = jnp.pad(bias, ((0, 0), (0, out_pad - OUT)))

    return {
        "w_fold": w_fold,                 # (D, OUT_pad), compute dtype
        "bias": bias,                     # (1, OUT_pad), f32
        "out_dim": OUT,
        "tn": tn,
        "compute_dtype": compute_dtype,
    }


def linear_module_forward(t, params):
    """t: (B, C, IN_DIM) with C*IN_DIM == D.  Equivalent to
    PyTorch: Linear_no_bias(LayerNorm(t.reshape(B, -1)))."""
    w_fold = params["w_fold"]
    bias = params["bias"]
    OUT = params["out_dim"]
    TN = params["tn"]
    compute_dtype = params["compute_dtype"]
    D, OUT_pad = w_fold.shape

    B = t.shape[0]
    x = t.reshape(B, D)                   # same as t.reshape(t.size(0), -1)
    out_dtype = x.dtype

    budget = _vmem_budget_bytes()
    x_item = jnp.dtype(x.dtype).itemsize
    w_item = compute_dtype.itemsize
    o_item = jnp.dtype(out_dtype).itemsize

    # Sublane packing of the activation dtype: f32 -> 8, bf16 -> 16, int8/fp8 -> 32.
    pack = max(8, 32 // x_item)

    # Batch tile: as big as possible (caps grid overhead, fills the MXU rows),
    # shrunk until scratch + double-buffered tiles fit the VMEM budget.
    TM = min(512, _round_up(B, pack))

    def vmem_need(tm):
        return (tm * D * w_item           # xn scratch (compute dtype)
                + 2 * tm * D * x_item     # x tile (double buffered)
                + 2 * D * TN * w_item     # weight tile (double buffered)
                + 2 * TN * 4              # bias row
                + 2 * tm * TN * o_item)   # output tile (double buffered)

    while TM > pack and vmem_need(TM) > budget:
        TM = max(pack, _round_up(TM // 2, pack))
    # TODO(synk): K-split path (third "arbitrary" grid axis over D with an f32
    # accumulator + LN-stats prologue) for very large D that overflows VMEM even
    # at TM == pack (mainly a v7x concern).

    B_pad = _round_up(B, TM)
    if B_pad != B:
        # Padded rows normalize to 0 and only produce the bias row; sliced off below.
        x = jnp.pad(x, ((0, B_pad - B), (0, 0)))

    n_b = B_pad // TM
    n_out = OUT_pad // TN

    # Loop-order selection by re-read volume:
    #   batch-outer (xn cached): weight re-read   (n_b  - 1) * D * OUT_pad * w_item
    #   out-outer  (w resident): x re-read + LN   (n_out - 1) * B_pad * D * x_item
    batch_outer = (D * OUT_pad * (n_b - 1) * w_item
                   <= B_pad * D * (n_out - 1) * x_item)

    vmem_limit = int(min(budget, vmem_need(TM) + (4 << 20)))

    ln_passes = 1 if batch_outer else n_out
    cost = pl.CostEstimate(
        flops=int(2 * B_pad * D * OUT_pad + 5 * B_pad * D * ln_passes),
        transcendentals=int(B_pad * ln_passes),
        bytes_accessed=int(
            B_pad * D * x_item * (1 if batch_outer else n_out)
            + D * OUT_pad * w_item * (n_b if batch_outer else 1)
            + OUT_pad * 4 * (n_b if batch_outer else 1)
            + B_pad * OUT_pad * o_item),
    )

    if batch_outer:
        grid = (n_b, n_out)
        in_specs = [
            # x: block index changes only with the batch tile -> fetched once per
            #    batch tile; LN result cached in the xn scratch for all OUT tiles.
            pl.BlockSpec((TM, D), lambda i, j: (i, 0)),
            pl.BlockSpec((D, TN), lambda i, j: (0, j)),
            pl.BlockSpec((1, TN), lambda i, j: (0, j)),
        ]
        out_spec = pl.BlockSpec((TM, TN), lambda i, j: (i, j))
        kernel = _ln_linear_kernel_batch_outer
        scratch = [pltpu.VMEM((TM, D), compute_dtype)]
        # OUT axis carries the xn-scratch dependency -> keep it sequential.
        semantics = ("parallel", "arbitrary")
    else:
        grid = (n_out, n_b)
        in_specs = [
            pl.BlockSpec((TM, D), lambda j, i: (i, 0)),
            # weight: depends only on the outer OUT index -> VMEM-resident across
            # all inner batch tiles.
            pl.BlockSpec((D, TN), lambda j, i: (0, j)),
            pl.BlockSpec((1, TN), lambda j, i: (0, j)),
        ]
        out_spec = pl.BlockSpec((TM, TN), lambda j, i: (i, j))
        kernel = _ln_linear_kernel_out_outer
        scratch = []
        semantics = ("parallel", "parallel")

    out = pl.pallas_call(
        kernel,
        out_shape=jax.ShapeDtypeStruct((B_pad, OUT_pad), out_dtype),
        grid=grid,
        in_specs=in_specs,
        out_specs=out_spec,
        scratch_shapes=scratch,
        compiler_params=pltpu.CompilerParams(
            dimension_semantics=semantics,
            vmem_limit_bytes=vmem_limit,
        ),
        cost_estimate=cost,
    )(x, w_fold, bias)

    return out[:B, :OUT]


# --------------------------------------------------------------------------- #
# Self-test
# --------------------------------------------------------------------------- #
if __name__ == "__main__":
    # Small shapes consistent with the module: channel=4, in_dim=32 -> D=128, out_dim=64
    B, C, IN_DIM, OUT = 8, 4, 32, 64
    D = C * IN_DIM

    key = jax.random.PRNGKey(0)
    k_t, k_g, k_b, k_w = jax.random.split(key, 4)

    t = jax.random.normal(k_t, (B, C, IN_DIM), dtype=jnp.float32)
    # Deterministic synthetic parameters (shapes from the module's __init__).
    gamma = 1.0 + 0.1 * jax.random.normal(k_g, (D,), dtype=jnp.float32)    # ln.weight
    beta = 0.1 * jax.random.normal(k_b, (D,), dtype=jnp.float32)           # ln.bias
    w = jax.random.normal(k_w, (D, OUT), dtype=jnp.float32) / jnp.sqrt(D)  # linear.weight.T

    params = prepare_linear_params(gamma, beta, w)     # one-time weight fold/pad
    out = linear_module_forward(t, params)
    out = jax.block_until_ready(out)

    # Reference check in plain JAX (LayerNorm + Linear(bias=False)).
    x = t.reshape(B, -1)
    mu = jnp.mean(x, axis=-1, keepdims=True)
    var = jnp.mean((x - mu) ** 2, axis=-1, keepdims=True)
    xn = (x - mu) * jax.lax.rsqrt(var + 1e-5) * gamma + beta
    ref = xn @ w

    assert out.shape == (B, OUT)
    assert jnp.allclose(out, ref, atol=2e-4, rtol=2e-4)

    print("KERNEL_OK")
</pallas_src>

<mosaic_0001>
module attributes {stable_mosaic.version = 11 : i64} {
  func.func @_ln_linear_kernel_batch_outer(%arg0: i32, %arg1: i32, %arg2: memref<8x128xf32, #tpu.memory_space<vmem>>, %arg3: memref<128x128xf32, #tpu.memory_space<vmem>>, %arg4: memref<1x128xf32, #tpu.memory_space<vmem>>, %arg5: memref<8x128xf32, #tpu.memory_space<vmem>>, %arg6: memref<8x128xf32, #tpu.memory_space<vmem>>) attributes {dimension_semantics = [#tpu.dimension_semantics<parallel>, #tpu.dimension_semantics<arbitrary>], iteration_bounds = array<i64: 1, 1>, scalar_prefetch = 0 : i64, scratch_operands = 1 : i64, tpu.core_type = #tpu.core_type<tc>, window_params = [{transform_indices = @transform_0, window_bounds = array<i64: 8, 128>}, {transform_indices = @transform_1, window_bounds = array<i64: 128, 128>}, {transform_indices = @transform_2, window_bounds = array<i64: 1, 128>}, {transform_indices = @transform_3, window_bounds = array<i64: 8, 128>}]} {
    %c0_i32 = arith.constant 0 : i32
    %0 = arith.cmpi eq, %arg1, %c0_i32 : i32
    %1 = arith.extui %0 : i1 to i32
    %c0_i32_0 = arith.constant 0 : i32
    %2 = arith.cmpi ne, %1, %c0_i32_0 : i32
    scf.if %2 {
      %c0_8 = arith.constant 0 : index
      %c0_9 = arith.constant 0 : index
      %10 = vector.load %arg2[%c0_8, %c0_9] : memref<8x128xf32, #tpu.memory_space<vmem>>, vector<8x128xf32>
      %cst_10 = arith.constant dense<0.000000e+00> : vector<8xf32>
      %11 = vector.multi_reduction <add>, %10, %cst_10 [1] : vector<8x128xf32> to vector<8xf32>
      %12 = vector.shape_cast %11 : vector<8xf32> to vector<8x1xf32>
      %13 = arith.mulf %10, %10 : vector<8x128xf32>
      %cst_11 = arith.constant dense<0.000000e+00> : vector<8xf32>
      %14 = vector.multi_reduction <add>, %13, %cst_11 [1] : vector<8x128xf32> to vector<8xf32>
      %15 = vector.shape_cast %14 : vector<8xf32> to vector<8x1xf32>
      %cst_12 = arith.constant 7.812500e-03 : f32
      %16 = vector.broadcast %cst_12 : f32 to vector<8x1xf32>
      %17 = arith.mulf %12, %16 : vector<8x1xf32>
      %cst_13 = arith.constant 7.812500e-03 : f32
      %18 = vector.broadcast %cst_13 : f32 to vector<8x1xf32>
      %19 = arith.mulf %15, %18 : vector<8x1xf32>
      %20 = arith.mulf %17, %17 : vector<8x1xf32>
      %21 = arith.subf %19, %20 : vector<8x1xf32>
      %22 = vector.broadcast %17 : vector<8x1xf32> to vector<8x128xf32>
      %23 = arith.subf %10, %22 : vector<8x128xf32>
      %cst_14 = arith.constant 9.99999974E-6 : f32
      %24 = vector.broadcast %cst_14 : f32 to vector<8x1xf32>
      %25 = arith.addf %21, %24 : vector<8x1xf32>
      %26 = math.rsqrt %25 : vector<8x1xf32>
      %27 = vector.broadcast %26 : vector<8x1xf32> to vector<8x128xf32>
      %28 = arith.mulf %23, %27 : vector<8x128xf32>
      %c0_15 = arith.constant 0 : index
      %c0_16 = arith.constant 0 : index
      %29 = vector.load %arg6[%c0_15, %c0_16] : memref<8x128xf32, #tpu.memory_space<vmem>>, vector<8x128xf32>
      tpu.vector_store %arg6[%c0_15, %c0_16], %28 {strides = array<i32>} : memref<8x128xf32, #tpu.memory_space<vmem>>, vector<8x128xf32>,
    } else {
    }
    %c0 = arith.constant 0 : index
    %c0_1 = arith.constant 0 : index
    %3 = vector.load %arg6[%c0, %c0_1] : memref<8x128xf32, #tpu.memory_space<vmem>>, vector<8x128xf32>
    %c0_2 = arith.constant 0 : index
    %c0_3 = arith.constant 0 : index
    %4 = vector.load %arg3[%c0_2, %c0_3] : memref<128x128xf32, #tpu.memory_space<vmem>>, vector<128x128xf32>
    %cst = arith.constant dense<0.000000e+00> : vector<8x128xf32>
    %5 = tpu.matmul %3, %4, %cst {dimension_numbers = #tpu.dot_dimension_numbers<[1], [0], [0], [1], [0, 0, 1, 1], [], []>} : vector<8x128xf32>, vector<128x128xf32>, vector<8x128xf32> -> vector<8x128xf32>
    %c0_4 = arith.constant 0 : index
    %c0_5 = arith.constant 0 : index
    %6 = vector.load %arg4[%c0_4, %c0_5] : memref<1x128xf32, #tpu.memory_space<vmem>>, vector<1x128xf32>
    %7 = vector.broadcast %6 : vector<1x128xf32> to vector<8x128xf32>
    %8 = arith.addf %5, %7 : vector<8x128xf32>
    %c0_6 = arith.constant 0 : index
    %c0_7 = arith.constant 0 : index
    %9 = vector.load %arg5[%c0_6, %c0_7] : memref<8x128xf32, #tpu.memory_space<vmem>>, vector<8x128xf32>
    tpu.vector_store %arg5[%c0_6, %c0_7], %8 {strides = array<i32>} : memref<8x128xf32, #tpu.memory_space<vmem>>, vector<8x128xf32>,
    return
  }
  func.func @transform_0(%arg0: i32, %arg1: i32) -> (i32, i32) {
    %c0_i32 = arith.constant 0 : i32
    %c0_i32_0 = arith.constant 0 : i32
    return %arg0, %c0_i32 : i32, i32
  }
  func.func @transform_1(%arg0: i32, %arg1: i32) -> (i32, i32) {
    %c0_i32 = arith.constant 0 : i32
    %c0_i32_0 = arith.constant 0 : i32
    return %c0_i32, %arg1 : i32, i32
  }
  func.func @transform_2(%arg0: i32, %arg1: i32) -> (i32, i32) {
    %c0_i32 = arith.constant 0 : i32
    %c0_i32_0 = arith.constant 0 : i32
    return %c0_i32, %arg1 : i32, i32
  }
  func.func @transform_3(%arg0: i32, %arg1: i32) -> (i32, i32) {
    %c0_i32 = arith.constant 0 : i32
    return %arg0, %arg1 : i32, i32
  }
}

</mosaic_0001>

<bundles_post_ra>
// kernel: tpu_custom_call.1
= control target key start
LH: loop header
LB: loop body
LE: loop exit
PB: predicated region body
PF: predicated region fallthrough
CT: control target
= control target key end

     0   :  { %8 = vsyncpa [#allocation4], 0  ;;  %s404_s0 = inlined_call_operand.hbm [shape: f32[8,128], index: 0, kind: input, shape index: {}]   ;;  %s405_s1 = inlined_call_operand.hbm [shape: f32[128,128], index: 1, kind: input, shape index: {}]   ;;  %s406_s2 = inlined_call_operand.vmem [shape: f32[1,128], index: 2, kind: input, shape index: {}]   ;;  %s407_s3 = inlined_call_operand.hbm [shape: f32[8,128], index: 3, kind: output, shape index: {}]  }
   0x1   :  { %9 = vsyncpa [#allocation7], 0 }
   0x2   :  { %10 = vsyncpa [#allocation5], 0  ;;  %s330_s12 = smov [#allocation3]   ;;  %s331_s14 = smov [#allocation6]  }
   0x3   :  { %s17_s13 = sshll.u32 %s330_s12, 4  ;;  %s26_s15 = sshll.u32 %s331_s14, 4  ;;  %s18_s13 = int_to_ptr.vmem [resolvable:$true] %s17_s13  ;;  %s358_s15 = int_to_ptr.vmem [resolvable:$true] %s26_s15 }
   0x4   :  { %s258_s18 = scalar_lea.hbm %s404_s0, 128 }
   0x5   :  { %p259_p0 = scmp.ne.s32.totalorder %s404_s0, %s258_s18  ;;  %p262_p1 = scmp.lt.u32.totalorder %s258_s18, %s404_s0 }
   0x7   :  { %p264_p2 = pnand %p262_p1, %p259_p0 }
   0x9   :  { %267 = shalt.err (!%p264_p2)
}
   0xa   :  { %s268_s23 = scalar_lea.vmem %s18_s13, 128  ;;  %p273_p4 = scmp.lt.s32.totalorder %s18_s13, %s18_s13 }
   0xb   :  { %p269_p3 = scmp.ne.s32.totalorder %s18_s13, %s268_s23  ;;  %p274_p5 = scmp.lt.s32.totalorder %s268_s23, %s268_s23 }
   0xd   :  { %p275_p6 = por %p274_p5, %p273_p4 }
   0xf   :  { %p276_p7 = pnand %p275_p6, %p269_p3 }
  0x11   :  { %279 = shalt.err (!%p276_p7)
}
  0x12   :  { %20 = dma.hbm_to_vmem [thread:$0]  %s404_s0, 128, %s18_s13, [#allocation4]  }
  0x13   :  { %s280_s28 = scalar_lea.hbm %s405_s1, 2048 }
  0x14   :  { %p281_p8 = scmp.ne.s32.totalorder %s405_s1, %s280_s28  ;;  %p284_p9 = scmp.lt.u32.totalorder %s280_s28, %s405_s1 }
  0x16   :  { %p286_p10 = pnand %p284_p9, %p281_p8 }
  0x18   :  { %289 = shalt.err (!%p286_p10)
}
  0x19   :  { %s290_s6 = scalar_lea.vmem %s358_s15, 2048  ;;  %p295_p12 = scmp.lt.s32.totalorder %s358_s15, %s358_s15 }
  0x1a   :  { %p291_p11 = scmp.ne.s32.totalorder %s358_s15, %s290_s6  ;;  %p296_p13 = scmp.lt.s32.totalorder %s290_s6, %s290_s6 }
  0x1c   :  { %p297_p0 = por %p296_p13, %p295_p12 }
  0x1e   :  { %p298_p1 = pnand %p297_p0, %p291_p11 }
  0x20   :  { %301 = shalt.err (!%p298_p1)
}
  0x21   :  { %s332_s0 = smov 128   ;;  %s333_s7 = smov 8  }
  0x22   :  { %32 = dma.hbm_to_vmem [thread:$0]  %s405_s1, 2048, %s358_s15, [#allocation7], %s332_s0, %s332_s0, %s333_s7  }
  0x23   :  { %324 = dma.done.wait [#allocation4], 128  }
  0x24   :  { %325 = vsyncadd [#allocation4], 4294967168 }
  0x25   :  { %326 = dma.done.wait [#allocation7], 2048  }
  0x26   :  { %327 = vsyncadd [#allocation7], 4294965248  ;;  %v334_v0 = vmov 0.0|0.0   ;;  %v45_v1 = vld [vmem:[#allocation3] sm:$0xff]  ;;  %v61_v2 = vld [vmem:[#allocation6] sm:$0xff]  ;;  %vm335_vm0 = vmmov 0  }
  0x27   :  { %224 = vmatprep.subr.bf16.mxu0 %v334_v0  ;;  %v62_v3 = vld [vmem:[#allocation6 + $0x8] sm:$0xff]  ;;  %46 = vadd.xlane.f32.xlu0 %v45_v1  ;;  %v48_v4 = vmul.f32 %v45_v1, %v45_v1  ;;  %v63_v6 = vld [vmem:[#allocation6 + $0x10] sm:$0xff]  ;;  %v64_v7 = vld [vmem:[#allocation6 + $0x18] sm:$0xff]  ;;  %v336_v23 = vmov 0.0   ;;  %s337_s11 = smov [#allocation8]  }
  0x28   :  { %v225_v5 = vpack.c.bf16 %v62_v3, %v61_v2  ;;  %v228_v8 = vpack.c.bf16 %v64_v7, %v63_v6  ;;  %v65_v9 = vld [vmem:[#allocation6 + $0x20] sm:$0xff]  ;;  %v66_v10 = vld [vmem:[#allocation6 + $0x28] sm:$0xff]  ;;  %v67_v12 = vld [vmem:[#allocation6 + $0x30] sm:$0xff]  ;;  %221 = vmatprep.mubr.msk.f32.mxu0 %vm335_vm0, %v336_v23  ;;  %s161_s12 = sshll.u32 %s337_s11, 4  ;;  %s162_s12 = int_to_ptr.vmem [resolvable:$true] %s161_s12 }
  0x29   :  { %v231_v11 = vpack.c.bf16 %v66_v10, %v65_v9  ;;  %v68_v13 = vld [vmem:[#allocation6 + $0x38] sm:$0xff]  ;;  %v69_v15 = vld [vmem:[#allocation6 + $0x40] sm:$0xff]  ;;  %v70_v16 = vld [vmem:[#allocation6 + $0x48] sm:$0xff]  ;;  %s302_s13 = scalar_lea.vmem %s162_s12, 128  ;;  %p307_p3 = scmp.lt.s32.totalorder %s162_s12, %s162_s12 }
  0x2a   :  { %226 = vmatpush3.bf16.msra.mxu0 %v225_v5  ;;  %v234_v14 = vpack.c.bf16 %v68_v13, %v67_v12  ;;  %v237_v17 = vpack.c.bf16 %v70_v16, %v69_v15  ;;  %v71_v18 = vld [vmem:[#allocation6 + $0x50] sm:$0xff]  ;;  %v72_v19 = vld [vmem:[#allocation6 + $0x58] sm:$0xff]  ;;  %v73_v21 = vld [vmem:[#allocation6 + $0x60] sm:$0xff]  ;;  %p303_p2 = scmp.ne.s32.totalorder %s162_s12, %s302_s13  ;;  %p308_p4 = scmp.lt.s32.totalorder %s302_s13, %s302_s13 }
  0x2b   :  { %227 = vmatprep.subr.bf16.mxu0 %v334_v0  ;;  %49 = vadd.xlane.f32.xlu0 %v48_v4  ;;  %v240_v20 = vpack.c.bf16 %v72_v19, %v71_v18  ;;  %v74_v22 = vld [vmem:[#allocation6 + $0x68] sm:$0xff]  ;;  %v75_v25 = vld [vmem:[#allocation6 + $0x70] sm:$0xff]  ;;  %v76_v26 = vld [vmem:[#allocation6 + $0x78] sm:$0xff] }
  0x2c   :  { %v243_v24 = vpack.c.bf16 %v74_v22, %v73_v21  ;;  %v246_v27 = vpack.c.bf16 %v76_v26, %v75_v25  ;;  %v171_v38 = vld [vmem:[%s406_s2] ss:$0 sm:$0xff]  ;;  %p309_p5 = por %p308_p4, %p307_p3 }
  0x2e   :  { %229 = vmatpush3.bf16.msra.mxu0 %v228_v8  ;;  %p310_p6 = pnand %p309_p5, %p303_p2 }
  0x2f   :  { %230 = vmatprep.subr.bf16.mxu0 %v334_v0 }
  0x32   :  { %232 = vmatpush3.bf16.msra.mxu0 %v231_v11 }
  0x33   :  { %233 = vmatprep.subr.bf16.mxu0 %v334_v0 }
  0x36   :  { %235 = vmatpush3.bf16.msra.mxu0 %v234_v14 }
  0x37   :  { %236 = vmatprep.subr.bf16.mxu0 %v334_v0 }
  0x3a   :  { %238 = vmatpush3.bf16.msra.mxu0 %v237_v17 }
  0x3b   :  { %239 = vmatprep.subr.bf16.mxu0 %v334_v0 }
  0x3e   :  { %241 = vmatpush3.bf16.msra.mxu0 %v240_v20 }
  0x3f   :  { %242 = vmatprep.subr.bf16.mxu0 %v334_v0 }
  0x42   :  { %244 = vmatpush3.bf16.msra.mxu0 %v243_v24 }
  0x43   :  { %245 = vmatprep.subr.bf16.mxu0 %v334_v0 }
  0x46   :  { %247 = vmatpush3.bf16.msra.mxu0 %v246_v27 }
  0xb4   :  { %v47_v28 = vpop.xlane.xlu0 %46 }
  0xb5   :  { %v51_v29 = vmul.f32 0.0078125, %v47_v28 }
  0xb7   :  { %v53_v31 = vmul.f32 %v51_v29, %v51_v29  ;;  %v55_v35 = vsub.f32 %v45_v1, %v51_v29 }
  0xb8   :  { %v50_v30 = vpop.xlane.xlu0 %49 }
  0xb9   :  { %v52_v32 = vmul.f32 0.0078125, %v50_v30 }
  0xbb   :  { %v54_v33 = vsub.f32 %v52_v32, %v53_v31 }
  0xbd   :  { %v56_v34 = vadd.f32 1e-05, %v54_v33 }
  0xbf   :  { %256 = vrsqrt.f32 %v56_v34 }
  0xc9   :  { %v257_v36 = vpop.eup %256 }
  0xca   :  { %v58_v37 = vmul.f32 %v257_v36, %v55_v35 }
  0xcc   :  { %222 = vmatmul.mubr.f32.vlgmr.msra.gmra.mrb[0].mxu0 %v58_v37 }
 0x19f   :  { %v150_v39 = vpop.f32.mrb[0].mxu0 }
 0x1a0   :  { %v151_v40 = vadd.f32 %v171_v38, %v150_v39  ;;  %v223_v41 = vpop.f32.mrb[1].mxu0 }
 0x1a2   :  { %154 = vst [vmem:[#allocation8] sm:$0xff] %v151_v40 }
 0x1a3   :  { %313 = shalt.err (!%p310_p6)
}
 0x1a4   :  { %s314_s16 = scalar_lea.hbm %s407_s3, 128 }
 0x1a5   :  { %p315_p7 = scmp.ne.s32.totalorder %s407_s3, %s314_s16  ;;  %p318_p8 = scmp.lt.u32.totalorder %s314_s16, %s407_s3 }
 0x1a7   :  { %p320_p9 = pnand %p318_p8, %p315_p7 }
 0x1a9   :  { %323 = shalt.err (!%p320_p9)
}
 0x1aa   :  { %164 = dma.vmem_to_hbm [thread:$0]  %s162_s12, 128, %s407_s3, [#allocation5]  }
 0x1ab   :  { %328 = dma.done.wait [#allocation5], 128  }
 0x1ac   :  { %329 = vsyncadd [#allocation5], 4294967168 }
 0x1ad   :  { %168 = vsyncpa [#allocation4], 1 }
 0x1ae   :  { %169 = vsyncpa [#allocation7], 1 }
 0x1af   :  { %170 = vsyncpa [#allocation5], 1 }

</bundles_post_ra>
